<compile_context>
chip_gen: v5e
topology: v5e:2x2
jax: 0.10.0
libtpu: 0.0.40
codegen_flags: <defaults>
</compile_context>

<pallas_src>
import functools

import jax
import jax.numpy as jnp
from jax import lax
from jax.experimental import pallas as pl
from jax.experimental.pallas import tpu as pltpu

LABEL_SMOOTHING = 0.5


def _sum2d(x):
    # lane-axis reduce first, then sublane axis -> (1, 1)
    return jnp.sum(jnp.sum(x, axis=1, keepdims=True), axis=0, keepdims=True)


# --------------------------------------------------------------------------- #
# MMD kernel: one grid step over the concatenated [source; target] matrix.    #
# --------------------------------------------------------------------------- #
def mmd_kernel(total_ref, out_ref, *, kernel_type, kernel_mul, kernel_num, bs):
    tot = total_ref[...]                                   # [T, D], native dtype
    T, D = tot.shape
    bt = T - bs
    tot_f = tot.astype(jnp.float32)

    if kernel_type == "linear":
        ridx = lax.broadcasted_iota(jnp.int32, (T, 1), 0)
        is_src = ridx < bs
        src_mean = jnp.sum(jnp.where(is_src, tot_f, 0.0),
                           axis=0, keepdims=True) / float(bs)        # [1, D]
        tgt_mean = jnp.sum(jnp.where(is_src, 0.0, tot_f),
                           axis=0, keepdims=True) / float(bt)        # [1, D]
        delta = src_mean - tgt_mean
        out_ref[...] = jnp.sum(delta * delta, axis=1, keepdims=True)  # (1, 1)
        return

    # ---- RBF branch -------------------------------------------------------
    # Pairwise squared distances via the MXU gram matrix (f32 accumulate).
    # TODO(synk): for large T, block the (T,T) gram/kmat over row tiles (two-pass:
    # bandwidth, then weighted kernel sum) so temporaries fit v7x's 64 MiB VMEM.
    gram = lax.dot_general(tot, tot, (((1,), (1,)), ((), ())),
                           preferred_element_type=jnp.float32)       # [T, T]
    p = tot_f * tot_f                                                # [T, D]
    sq_col = jnp.sum(p, axis=1, keepdims=True)                       # [T, 1]
    # [1, T] row form via a tiny ones-vector matmul (avoids a transpose and any
    # (T,T) diagonal masking/reduction).
    sq_row = lax.dot_general(jnp.ones((1, D), jnp.float32), p,
                             (((1,), (1,)), ((), ())),
                             preferred_element_type=jnp.float32)     # [1, T]
    l2 = jnp.maximum(sq_col + sq_row - 2.0 * gram, 0.0)              # [T, T]

    # Data-driven bandwidth (fix_sigma is always None in the module); sum(L2) is
    # derived analytically so no extra full (T,T) reduction is needed.
    sum_sq = jnp.sum(sq_col, axis=0, keepdims=True)                  # (1, 1)
    sum_l2 = 2.0 * float(T) * sum_sq - 2.0 * _sum2d(gram)            # (1, 1)
    bw = sum_l2 / float(T * T - T)
    bw = bw / (kernel_mul ** (kernel_num // 2))

    if kernel_mul == 2.0:
        # exp(-l2/(bw*2^k)) = z^(2^(num-1-k)) with z the widest-bandwidth kernel:
        # 1 EUP exp + (kernel_num-1) VPU squarings instead of kernel_num full exps.
        widest = bw * (kernel_mul ** (kernel_num - 1))               # (1, 1)
        z = jnp.exp(l2 * (-1.0 / widest))
        kmat = z
        pw = z
        for _ in range(kernel_num - 1):
            pw = pw * pw
            kmat = kmat + pw
    else:
        inv_bw = 1.0 / bw                                            # (1, 1)
        kmat = jnp.exp(l2 * (-inv_bw))
        for k in range(1, kernel_num):
            kmat = kmat + jnp.exp(l2 * (-(inv_bw / (kernel_mul ** k))))

    # xx + yy - xy - yx == sum_ij w_i * w_j * K_ij with w = +1/bs (source rows),
    # -1/bt (target rows): one broadcast multiply + two reductions.
    ridx = lax.broadcasted_iota(jnp.int32, (T, 1), 0)
    cidx = lax.broadcasted_iota(jnp.int32, (1, T), 1)
    w_row = jnp.where(ridx < bs, 1.0 / bs, -1.0 / bt)                # [T, 1]
    w_col = jnp.where(cidx < bs, 1.0 / bs, -1.0 / bt)                # [1, T]
    lane_red = jnp.sum(kmat * w_col, axis=1, keepdims=True)          # [T, 1]
    out_ref[...] = jnp.sum(lane_red * w_row, axis=0, keepdims=True)  # (1, 1)


# --------------------------------------------------------------------------- #
# CE kernel: label-smoothed cross-entropy, tiled/pipelined over the batch N.  #
# --------------------------------------------------------------------------- #
def ce_kernel(feat_ref, lab_ref, out_ref, *, n_rows, eps, scale):
    logits = feat_ref[...].astype(jnp.float32)                       # [tn, C]
    tn, C = logits.shape
    gt = lab_ref[...]                                                # [tn, 1] int32

    class_ids = lax.broadcasted_iota(jnp.int32, (tn, C), 1)
    onehot = class_ids == gt

    m = jnp.max(logits, axis=1, keepdims=True)
    lse = jnp.log(jnp.sum(jnp.exp(logits - m), axis=1, keepdims=True)) + m
    logit_gt = jnp.sum(jnp.where(onehot, logits, 0.0), axis=1, keepdims=True)
    sum_logits = jnp.sum(logits, axis=1, keepdims=True)
    # label-smoothed CE without materializing the full log-softmax tile
    ce_per = -((1.0 - eps) * (logit_gt - lse)
               + (eps / C) * (sum_logits - C * lse))                 # [tn, 1]

    # Tail-tile mask.  All ops above are strictly row-wise, so garbage/Inf in
    # padded rows cannot leak into valid rows; the select (not a multiply) then
    # drops them before the tile reduction.
    row_g = pl.program_id(0) * tn + lax.broadcasted_iota(jnp.int32, (tn, 1), 0)
    ce_per = jnp.where(row_g < n_rows, ce_per, 0.0)
    out_ref[0] = scale * jnp.sum(ce_per, axis=0, keepdims=True)       # (1, 1)


# --------------------------------------------------------------------------- #
# Wrapper                                                                     #
# --------------------------------------------------------------------------- #
def _vmem_capacity_bytes():
    try:
        return int(pltpu.get_tpu_info().vmem_capacity_bytes)
    except Exception:
        return 64 * 1024 * 1024  # conservative fallback (v7x per-TC VMEM)


def mmd_loss(source, target, mfeat, mlabel, *,
             kernel_type="rbf", kernel_mul=2.0, kernel_num=5, tile_n=None):
    Bs, D = source.shape
    Bt, Dt = target.shape
    assert D == Dt
    assert Bs > 0 and Bt > 0 and Bs + Bt > 1, "degenerate domain batch sizes"
    N, C = mfeat.shape
    assert mlabel.shape[0] == N and N > 0

    T = Bs + Bt
    total = jnp.concatenate([source, target], axis=0)                # [T, D]
    labels = mlabel.reshape(N, 1).astype(jnp.int32)

    # ---- generation-aware VMEM budget / tile sizing ----
    vmem_cap = _vmem_capacity_bytes()                 # 64 MiB (v7x) / 128 MiB (v5e/v6e)
    vmem_limit = max(32 * 1024 * 1024, min(vmem_cap // 2, 100 * 1024 * 1024))

    if tile_n is None:
        # largest tile whose double-buffered f32 logits (+labels) fits ~half the budget
        bytes_per_row = (C * 4 + 4) * 2
        max_rows = max(8, (vmem_limit // 2) // bytes_per_row)
        if N <= max_rows or N % 8 != 0:
            tile_n = N
        else:
            tile_n = max(8, (min(max_rows, 4096) // 8) * 8)
    assert tile_n == N or tile_n % 8 == 0, \
        "tile_n must be a multiple of 8 (TPU sublane tiling) or equal N"
    num_tiles = pl.cdiv(N, tile_n)

    # ---------------- MMD term: its own single-step pallas_call ----------------
    mmd_kern = functools.partial(
        mmd_kernel, kernel_type=kernel_type, kernel_mul=float(kernel_mul),
        kernel_num=int(kernel_num), bs=Bs)
    mmd_val = pl.pallas_call(
        mmd_kern,
        out_shape=jax.ShapeDtypeStruct((1, 1), jnp.float32),
        grid=(1,),
        in_specs=[pl.BlockSpec((T, D), lambda i: (0, 0))],
        out_specs=pl.BlockSpec((1, 1), lambda i: (0, 0)),
        compiler_params=pltpu.CompilerParams(
            dimension_semantics=("arbitrary",),
            vmem_limit_bytes=vmem_limit),
    )(total)

    # ---------------- CE term: pipelined over batch tiles ----------------
    ce_kern = functools.partial(
        ce_kernel, n_rows=N, eps=LABEL_SMOOTHING, scale=0.9 / N)
    ce_partials = pl.pallas_call(
        ce_kern,
        out_shape=jax.ShapeDtypeStruct((num_tiles, 1, 1), jnp.float32),
        grid=(num_tiles,),
        in_specs=[
            pl.BlockSpec((tile_n, C), lambda i: (i, 0)),   # pipelined logits tile
            pl.BlockSpec((tile_n, 1), lambda i: (i, 0)),   # matching label tile
        ],
        out_specs=pl.BlockSpec((1, 1, 1), lambda i: (i, 0, 0)),
        compiler_params=pltpu.CompilerParams(
            dimension_semantics=("parallel",),   # v7x: both TCs split the CE tiles
            vmem_limit_bytes=vmem_limit),
    )(mfeat, labels)

    # tiny final combine of the per-tile CE partials and the MMD value
    return 0.1 * mmd_val[0, 0] + jnp.sum(ce_partials)


def mmd_loss_ref(source, target, mfeat, mlabel, *,
                 kernel_type="rbf", kernel_mul=2.0, kernel_num=5):
    """Pure-JAX reference mirroring the PyTorch forward."""
    eps = LABEL_SMOOTHING
    C = mfeat.shape[1]
    logp = jax.nn.log_softmax(mfeat.astype(jnp.float32), axis=1)
    onehot = jax.nn.one_hot(mlabel, C, dtype=jnp.float32)
    q = (1.0 - eps) * onehot + eps / C
    ce = jnp.mean(-jnp.sum(q * logp, axis=1))

    if kernel_type == "linear":
        delta = (source.astype(jnp.float32).mean(0)
                 - target.astype(jnp.float32).mean(0))
        mmd = jnp.dot(delta, delta)
        return 0.1 * mmd + 0.9 * ce

    bs = source.shape[0]
    total = jnp.concatenate([source, target], axis=0).astype(jnp.float32)
    T = total.shape[0]
    diff = total[None, :, :] - total[:, None, :]
    l2 = jnp.sum(diff * diff, axis=2)
    bw = jnp.sum(l2) / (T * T - T)
    bw = bw / (kernel_mul ** (kernel_num // 2))
    kmat = sum(jnp.exp(-l2 / (bw * kernel_mul ** k)) for k in range(kernel_num))
    xx = jnp.mean(kmat[:bs, :bs])
    yy = jnp.mean(kmat[bs:, bs:])
    xy = jnp.mean(kmat[:bs, bs:])
    yx = jnp.mean(kmat[bs:, :bs])
    mmd = xx + yy - xy - yx
    return 0.1 * mmd + 0.9 * ce


if __name__ == "__main__":
    key = jax.random.PRNGKey(0)
    k1, k2, k3, k4 = jax.random.split(key, 4)

    # small shapes consistent with the forward:
    #   source [Bs, D], target [Bt, D] domain features; mfeat [N, C] logits; mlabel [N]
    Bs, Bt, D = 8, 16, 32
    N, C = 24, 16

    source = jax.random.normal(k1, (Bs, D), dtype=jnp.float32)
    target = jax.random.normal(k2, (Bt, D), dtype=jnp.float32)
    mfeat = jax.random.normal(k3, (N, C), dtype=jnp.float32)
    mlabel = jax.random.randint(k4, (N,), 0, C, dtype=jnp.int32)

    # default path: kernel_type='rbf', auto tile_n (single fat CE tile)
    loss_rbf = mmd_loss(source, target, mfeat, mlabel, kernel_type="rbf")
    jax.block_until_ready(loss_rbf)
    ref_rbf = mmd_loss_ref(source, target, mfeat, mlabel, kernel_type="rbf")
    assert jnp.allclose(loss_rbf, ref_rbf, rtol=1e-5, atol=1e-4), (loss_rbf, ref_rbf)

    # multi-tile CE path (exercises tail mask / per-tile partials)
    loss_rbf_t = mmd_loss(source, target, mfeat, mlabel, kernel_type="rbf", tile_n=8)
    jax.block_until_ready(loss_rbf_t)
    assert jnp.allclose(loss_rbf_t, ref_rbf, rtol=1e-5, atol=1e-4), (loss_rbf_t, ref_rbf)

    # linear branch of the same module
    loss_lin = mmd_loss(source, target, mfeat, mlabel, kernel_type="linear")
    jax.block_until_ready(loss_lin)
    ref_lin = mmd_loss_ref(source, target, mfeat, mlabel, kernel_type="linear")
    assert jnp.allclose(loss_lin, ref_lin, rtol=1e-5, atol=1e-4), (loss_lin, ref_lin)

    print("KERNEL_OK")
</pallas_src>

<mosaic_0001>
module attributes {stable_mosaic.version = 11 : i64} {
  func.func @mmd_kernel(%arg0: i32, %arg1: memref<24x32xf32, #tpu.memory_space<vmem>>, %arg2: memref<1x1xf32, #tpu.memory_space<vmem>>) attributes {dimension_semantics = [#tpu.dimension_semantics<arbitrary>], iteration_bounds = array<i64: 1>, scalar_prefetch = 0 : i64, scratch_operands = 0 : i64, tpu.core_type = #tpu.core_type<tc>, window_params = [{pipeline_mode = #tpu.pipeline_mode<synchronous>, transform_indices = @transform_0, window_bounds = array<i64: 24, 32>}, {pipeline_mode = #tpu.pipeline_mode<synchronous>, transform_indices = @transform_1, window_bounds = array<i64: 1, 1>}]} {
    %c0 = arith.constant 0 : index
    %c0_0 = arith.constant 0 : index
    %0 = vector.load %arg1[%c0, %c0_0] : memref<24x32xf32, #tpu.memory_space<vmem>>, vector<24x32xf32>
    %cst = arith.constant dense<0.000000e+00> : vector<24x24xf32>
    %1 = tpu.matmul %0, %0, %cst {dimension_numbers = #tpu.dot_dimension_numbers<[1], [1], [0], [0], [0, 0, 1, 0], [], []>} : vector<24x32xf32>, vector<24x32xf32>, vector<24x24xf32> -> vector<24x24xf32>
    %2 = arith.mulf %0, %0 : vector<24x32xf32>
    %cst_1 = arith.constant dense<0.000000e+00> : vector<24xf32>
    %3 = vector.multi_reduction <add>, %2, %cst_1 [1] : vector<24x32xf32> to vector<24xf32>
    %4 = vector.shape_cast %3 : vector<24xf32> to vector<24x1xf32>
    %cst_2 = arith.constant 1.000000e+00 : f32
    %5 = vector.broadcast %cst_2 : f32 to vector<1x32xf32>
    %cst_3 = arith.constant dense<0.000000e+00> : vector<1x24xf32>
    %6 = tpu.matmul %5, %2, %cst_3 {dimension_numbers = #tpu.dot_dimension_numbers<[1], [1], [0], [0], [0, 0, 1, 0], [], []>} : vector<1x32xf32>, vector<24x32xf32>, vector<1x24xf32> -> vector<1x24xf32>
    %7 = vector.broadcast %4 : vector<24x1xf32> to vector<24x24xf32>
    %8 = vector.broadcast %6 : vector<1x24xf32> to vector<24x24xf32>
    %9 = arith.addf %7, %8 : vector<24x24xf32>
    %cst_4 = arith.constant 2.000000e+00 : f32
    %10 = vector.broadcast %cst_4 : f32 to vector<24x24xf32>
    %11 = arith.mulf %10, %1 : vector<24x24xf32>
    %12 = arith.subf %9, %11 : vector<24x24xf32>
    %cst_5 = arith.constant 0.000000e+00 : f32
    %13 = vector.broadcast %cst_5 : f32 to vector<24x24xf32>
    %14 = arith.maximumf %12, %13 : vector<24x24xf32>
    %cst_6 = arith.constant dense<0.000000e+00> : vector<1xf32>
    %15 = vector.multi_reduction <add>, %4, %cst_6 [0] : vector<24x1xf32> to vector<1xf32>
    %16 = vector.shape_cast %15 : vector<1xf32> to vector<1x1xf32>
    %cst_7 = arith.constant 4.800000e+01 : f32
    %17 = vector.broadcast %cst_7 : f32 to vector<1x1xf32>
    %18 = arith.mulf %17, %16 : vector<1x1xf32>
    %cst_8 = arith.constant dense<0.000000e+00> : vector<24xf32>
    %19 = vector.multi_reduction <add>, %1, %cst_8 [1] : vector<24x24xf32> to vector<24xf32>
    %20 = vector.shape_cast %19 : vector<24xf32> to vector<24x1xf32>
    %cst_9 = arith.constant dense<0.000000e+00> : vector<1xf32>
    %21 = vector.multi_reduction <add>, %20, %cst_9 [0] : vector<24x1xf32> to vector<1xf32>
    %22 = vector.shape_cast %21 : vector<1xf32> to vector<1x1xf32>
    %cst_10 = arith.constant 2.000000e+00 : f32
    %23 = vector.broadcast %cst_10 : f32 to vector<1x1xf32>
    %24 = arith.mulf %23, %22 : vector<1x1xf32>
    %25 = arith.subf %18, %24 : vector<1x1xf32>
    %cst_11 = arith.constant 5.520000e+02 : f32
    %26 = vector.broadcast %cst_11 : f32 to vector<1x1xf32>
    %27 = arith.divf %25, %26 : vector<1x1xf32>
    %cst_12 = arith.constant 4.000000e+00 : f32
    %28 = vector.broadcast %cst_12 : f32 to vector<1x1xf32>
    %29 = arith.divf %27, %28 : vector<1x1xf32>
    %cst_13 = arith.constant 1.600000e+01 : f32
    %30 = vector.broadcast %cst_13 : f32 to vector<1x1xf32>
    %31 = arith.mulf %29, %30 : vector<1x1xf32>
    %cst_14 = arith.constant -1.000000e+00 : f32
    %32 = vector.broadcast %cst_14 : f32 to vector<1x1xf32>
    %33 = arith.divf %32, %31 : vector<1x1xf32>
    %34 = vector.broadcast %33 : vector<1x1xf32> to vector<24x24xf32>
    %35 = arith.mulf %14, %34 : vector<24x24xf32>
    %36 = math.exp %35 : vector<24x24xf32>
    %37 = arith.mulf %36, %36 : vector<24x24xf32>
    %38 = arith.addf %36, %37 : vector<24x24xf32>
    %39 = arith.mulf %37, %37 : vector<24x24xf32>
    %40 = arith.addf %38, %39 : vector<24x24xf32>
    %41 = arith.mulf %39, %39 : vector<24x24xf32>
    %42 = arith.addf %40, %41 : vector<24x24xf32>
    %43 = arith.mulf %41, %41 : vector<24x24xf32>
    %44 = arith.addf %42, %43 : vector<24x24xf32>
    %45 = tpu.iota {dimensions = array<i32: 0>} : vector<24x1xi32>
    %46 = tpu.iota {dimensions = array<i32: 1>} : vector<1x24xi32>
    %c8_i32 = arith.constant 8 : i32
    %47 = vector.broadcast %c8_i32 : i32 to vector<24x1xi32>
    %48 = arith.cmpi slt, %45, %47 : vector<24x1xi32>
    %cst_15 = arith.constant 1.250000e-01 : f32
    %cst_16 = arith.constant -6.250000e-02 : f32
    %49 = vector.broadcast %cst_15 : f32 to vector<24x1xf32>
    %50 = vector.broadcast %cst_16 : f32 to vector<24x1xf32>
    %51 = arith.select %48, %49, %50 : vector<24x1xi1>, vector<24x1xf32>
    %c8_i32_17 = arith.constant 8 : i32
    %52 = vector.broadcast %c8_i32_17 : i32 to vector<1x24xi32>
    %53 = arith.cmpi slt, %46, %52 : vector<1x24xi32>
    %cst_18 = arith.constant 1.250000e-01 : f32
    %cst_19 = arith.constant -6.250000e-02 : f32
    %54 = vector.broadcast %cst_18 : f32 to vector<1x24xf32>
    %55 = vector.broadcast %cst_19 : f32 to vector<1x24xf32>
    %56 = arith.select %53, %54, %55 : vector<1x24xi1>, vector<1x24xf32>
    %57 = vector.broadcast %56 : vector<1x24xf32> to vector<24x24xf32>
    %58 = arith.mulf %44, %57 : vector<24x24xf32>
    %cst_20 = arith.constant dense<0.000000e+00> : vector<24xf32>
    %59 = vector.multi_reduction <add>, %58, %cst_20 [1] : vector<24x24xf32> to vector<24xf32>
    %60 = vector.shape_cast %59 : vector<24xf32> to vector<24x1xf32>
    %61 = arith.mulf %60, %51 : vector<24x1xf32>
    %cst_21 = arith.constant dense<0.000000e+00> : vector<1xf32>
    %62 = vector.multi_reduction <add>, %61, %cst_21 [0] : vector<24x1xf32> to vector<1xf32>
    %63 = vector.shape_cast %62 : vector<1xf32> to vector<1x1xf32>
    %c0_22 = arith.constant 0 : index
    %c0_23 = arith.constant 0 : index
    %64 = vector.load %arg2[%c0_22, %c0_23] : memref<1x1xf32, #tpu.memory_space<vmem>>, vector<1x1xf32>
    tpu.vector_store %arg2[%c0_22, %c0_23], %63 {strides = array<i32>} : memref<1x1xf32, #tpu.memory_space<vmem>>, vector<1x1xf32>,
    return
  }
  func.func @transform_0(%arg0: i32) -> (i32, i32) {
    %c0_i32 = arith.constant 0 : i32
    %c0_i32_0 = arith.constant 0 : i32
    %c0_i32_1 = arith.constant 0 : i32
    return %c0_i32, %c0_i32_0 : i32, i32
  }
  func.func @transform_1(%arg0: i32) -> (i32, i32) {
    %c0_i32 = arith.constant 0 : i32
    %c0_i32_0 = arith.constant 0 : i32
    %c0_i32_1 = arith.constant 0 : i32
    return %c0_i32, %c0_i32_0 : i32, i32
  }
}

</mosaic_0001>

<bundles_post_ra>
// kernel: tpu_custom_call.1
= control target key start
LH: loop header
LB: loop body
LE: loop exit
PB: predicated region body
PF: predicated region fallthrough
CT: control target
= control target key end

     0   :  { %6 = vsyncpa [#allocation3], 0  ;;  %s412_s0 = inlined_call_operand.hbm [shape: f32[24,32], index: 0, kind: input, shape index: {}]   ;;  %s413_s1 = inlined_call_operand.hbm [shape: f32[1,1], index: 1, kind: output, shape index: {}]  }
   0x1   :  { %7 = vsyncpa [#allocation4], 0  ;;  %s12_s8 = sshll.u32 %s412_s0, 4  ;;  %s359_s9 = smov [#allocation2]   ;;  %s13_s8 = int_to_ptr.hbm [resolvable:$true] %s12_s8 }
   0x2   :  { %s14_s10 = sshll.u32 %s359_s9, 4  ;;  %s360_s11 = smov 128   ;;  %s15_s10 = int_to_ptr.vmem [resolvable:$true] %s14_s10 }
   0x3   :  { %s361_s12 = smov 8  }
   0x4   :  { %20 = dma.hbm_to_vmem [thread:$0]  %s13_s8, 384, %s15_s10, [#allocation3], %s360_s11, %s360_s11, %s361_s12  }
   0x5   :  { %355 = dma.done.wait [#allocation3], 384  }
   0x6   :  { %356 = vsyncadd [#allocation3], 4294966912  ;;  %vm28_vm0 = vcmask 261120   ;;  %v27_v0 = vld [vmem:[#allocation2 + $0x10] sm:$0xff]  ;;  %v26_v1 = vld [vmem:[#allocation2 + $0x8] sm:$0xff]  ;;  %v362_v9 = vmov 1.0  }
   0x7   :  { %v25_v2 = vld [vmem:[#allocation2] sm:$0xff]  ;;  %271 = vmatpush.xpose.msk.msra.mxu0 %vm28_vm0, %v27_v0  ;;  %281 = vmatpush.xpose.msk.msra.mxu2 %vm28_vm0, %v27_v0  ;;  %v66_v3 = vmul.f32 %v27_v0, %v27_v0  ;;  %v65_v5 = vmul.f32 %v26_v1, %v26_v1  ;;  %vm130_vm1 = vcmask 195584   ;;  %v363_v23 = vmov 552.0   ;;  %s366_s0 = smov [#allocation5]   ;;  %s261_s16 = sshll.u32 %s413_s1, 4  ;;  %s262_s16 = int_to_ptr.hbm [resolvable:$true] %s261_s16 }
   0x8   :  { %v64_v4 = vmul.f32 %v25_v2, %v25_v2  ;;  %282 = vmatpush.xpose.msk.msra.mxu3 %vm28_vm0, %v27_v0  ;;  %295 = vrcp.f32 %v363_v23  ;;  %v364_v24 = vmov 4.0   ;;  %s259_s13 = sshll.u32 %s366_s0, 4  ;;  %vm252_vm9 = vcmask 0   ;;  %s260_s13 = int_to_ptr.vmem [resolvable:$true] %s259_s13 }
   0x9   :  { %277 = vmatpush.xpose.msk.msra.mxu1 %vm28_vm0, %v66_v3  ;;  %v73_v7 = vsel %vm28_vm0, %v66_v3, 0.0  ;;  %v70_v8 = vsel %vm28_vm0, %v65_v5, 0.0  ;;  %297 = vrcp.f32 %v364_v24 }
   0xa   :  { %v67_v6 = vsel %vm28_vm0, %v64_v4, 0.0  ;;  %74 = vadd.xlane.f32.xlu2 %v73_v7 }
   0xb   :  { %68 = vadd.xlane.f32.xlu0 %v67_v6  ;;  %272 = vmatpush.xpose.msk.msra.mxu0 %vm28_vm0, %v26_v1 }
   0xc   :  { %283 = vmatpush.xpose.msk.msra.mxu2 %vm28_vm0, %v26_v1  ;;  %284 = vmatpush.xpose.msk.msra.mxu3 %vm28_vm0, %v26_v1 }
   0xd   :  { %278 = vmatpush.xpose.msk.msra.mxu1 %vm28_vm0, %v65_v5 }
   0xe   :  { %v296_v26 = vpop.eup %295 }
   0xf   :  { %273 = vmatpush.xpose.msk.msra.mxu0 %vm28_vm0, %v25_v2  ;;  %v298_v29 = vpop.eup %297  ;;  %v151_v32 = vmul.f32 552.0, %v296_v26  ;;  %vm155_vm2 = vweird.f32 %v296_v26 }
  0x10   :  { %285 = vmatpush.xpose.msk.msra.mxu2 %vm28_vm0, %v25_v2  ;;  %286 = vmatpush.xpose.msk.msra.mxu3 %vm28_vm0, %v25_v2  ;;  %v159_v34 = vmul.f32 4.0, %v298_v29  ;;  %vm163_vm3 = vweird.f32 %v298_v29 }
  0x11   :  { %279 = vmatpush.xpose.msk.msra.mxu1 %vm28_vm0, %v64_v4  ;;  %v152_v37 = vsub.f32 1.0, %v151_v32 }
  0x12   :  { %274 = vmatmul.msk.f32.vlgmr.msra.gmra.mxu0 %vm28_vm0, %v25_v2  ;;  %v160_v39 = vsub.f32 1.0, %v159_v34 }
  0x13   :  { %275 = vmatmul.msk.f32.vlgmr.msra.gmra.mxu2 %vm28_vm0, %v26_v1  ;;  %276 = vmatmul.msk.f32.vlgmr.msra.gmra.mxu3 %vm28_vm0, %v27_v0  ;;  %v153_v42 = vmul.f32 %v296_v26, %v152_v37 }
  0x14   :  { %71 = vadd.xlane.f32.xlu0 %v70_v8  ;;  %280 = vmatmul.msk.f32.vlgmr.msra.gmra.mxu1 %vm28_vm0, %v362_v9  ;;  %v161_v44 = vmul.f32 %v298_v29, %v160_v39 }
  0x15   :  { %v154_v47 = vadd.f32 %v296_v26, %v153_v42 }
  0x16   :  { %v162_v49 = vadd.f32 %v298_v29, %v161_v44 }
  0x17   :  { %v156_v52 = vsel %vm155_vm2, %v296_v26, %v154_v47  ;;  %v365_v47 = vmov -0.0625  }
  0x18   :  { %v164_v54 = vsel %vm163_vm3, %v298_v29, %v162_v49 }
  0x7d   :  { %v75_v19 = vpop.xlane.xlu2 %74 }
  0x7e   :  { %v69_v16 = vpop.xlane.xlu0 %68 }
  0x87   :  { %v72_v17 = vpop.xlane.xlu0 %71 }
  0x88   :  { %v121_v18 = vadd.f32 %v72_v17, %v69_v16 }
  0x8a   :  { %v122_v20 = vadd.f32 %v121_v18, %v75_v19 }
  0x8c   :  { %v123_v22 = vrot.slane %v122_v20, 4 }
  0x8e   :  { %v124_v25 = vadd.f32 %v123_v22, %v122_v20 }
  0x8f   :  { %v399_v10 = vpop.f32.mrf.mxu0 }
  0x90   :  { %v131_v11 = vsel %vm130_vm1, %v399_v10, 0.0  ;;  %v125_v30 = vrot.slane %v124_v25, 2  ;;  %v112_v4 = vmul.f32 2.0, %v399_v10 }
  0x91   :  { %132 = vadd.xlane.f32.xlu1 %v131_v11  ;;  %v105_v58 = vpop.f32.mrf.mxu1 }
  0x92   :  { %v126_v35 = vadd.f32 %v125_v30, %v124_v25  ;;  %v108_v59 = vperm.slane %v105_v58, 0  ;;  %v219_v25 = vlaneseq }
  0x94   :  { %v127_v40 = vrot.slane %v126_v35, 1  ;;  %v109_v62 = vadd.f32 %v108_v59, %v69_v16  ;;  %v110_v63 = vadd.f32 %v108_v59, %v72_v17  ;;  %v111_v1 = vadd.f32 %v108_v59, %v75_v19 }
  0x96   :  { %v58_v12 = vpop.f32.mrf.mxu2  ;;  %v61_v13 = vpop.f32.mrf.mxu3  ;;  %v128_v45 = vadd.f32 %v127_v40, %v126_v35  ;;  %v115_v8 = vsub.f32 %v109_v62, %v112_v4 }
  0x97   :  { %v134_v14 = vsel %vm130_vm1, %v58_v12, 0.0  ;;  %v137_v15 = vsel %vm130_vm1, %v61_v13, 0.0  ;;  %v113_v0 = vmul.f32 2.0, %v58_v12  ;;  %v114_v2 = vmul.f32 2.0, %v61_v13 }
  0x98   :  { %138 = vadd.xlane.f32.xlu2 %v137_v15  ;;  %v129_v50 = vmul.f32 48.0, %v128_v45  ;;  %v118_v12 = vmax.f32 %v115_v8, 0.0 }
  0x99   :  { %135 = vadd.xlane.f32.xlu1 %v134_v14  ;;  %v116_v9 = vsub.f32 %v110_v63, %v113_v0  ;;  %v117_v11 = vsub.f32 %v111_v1, %v114_v2 }
  0x9b   :  { %v119_v17 = vmax.f32 %v116_v9, 0.0  ;;  %v120_v13 = vmax.f32 %v117_v11, 0.0 }
 0x104   :  { %v133_v21 = vpop.xlane.xlu1 %132 }
 0x10b   :  { %v139_v28 = vpop.xlane.xlu2 %138 }
 0x10c   :  { %v136_v27 = vpop.xlane.xlu1 %135 }
 0x10d   :  { %v140_v31 = vadd.f32 %v136_v27, %v133_v21  ;;  %v220_v27 = vand.u32 127, %v219_v25 }
 0x10f   :  { %v141_v33 = vadd.f32 %v140_v31, %v139_v28  ;;  %vm227_vm8 = vcmp.lt.s32.totalorder %v220_v27, 8 }
 0x111   :  { %v142_v36 = vrot.slane %v141_v33, 4 }
 0x113   :  { %v143_v38 = vadd.f32 %v142_v36, %v141_v33 }
 0x115   :  { %v144_v41 = vrot.slane %v143_v38, 2 }
 0x117   :  { %v145_v43 = vadd.f32 %v144_v41, %v143_v38 }
 0x119   :  { %v146_v46 = vrot.slane %v145_v43, 1 }
 0x11b   :  { %v147_v48 = vadd.f32 %v146_v46, %v145_v43 }
 0x11d   :  { %v148_v51 = vmul.f32 2.0, %v147_v48  ;;  %v228_v48 = vsel %vm227_vm8, 0.125, %v365_v47 }
 0x11f   :  { %v149_v53 = vsub.f32 %v129_v50, %v148_v51 }
 0x121   :  { %v157_v55 = vmul.f32 %v156_v52, %v149_v53 }
 0x123   :  { %v165_v56 = vmul.f32 %v164_v54, %v157_v55 }
 0x125   :  { %v166_v57 = vmul.f32 16.0, %v165_v56 }
 0x127   :  { %299 = vrcp.f32 %v166_v57  ;;  %v178_v5 = vand.u32 2147483648, %v166_v57  ;;  %v176_v7 = vand.u32 2147483647, %v166_v57  ;;  %vm172_vm5 = vweird.f32 %v166_v57 }
 0x129   :  { %v179_v15 = vor.u32 1.1754944e-38, %v178_v5  ;;  %vm177_vm7 = vcmp.eq.f32.partialorder %v176_v7, 8.507059e+37 }
 0x12d   :  { %v300_v60 = vpop.eup %299 }
 0x12e   :  { %v168_v61 = vmul.f32 %v300_v60, %v166_v57  ;;  %vm173_vm4 = vweird.f32 %v300_v60 }
 0x12f   :  { %vm174_vm6 = vmor %vm172_vm5, %vm173_vm4 }
 0x130   :  { %v169_v3 = vsub.f32 1.0, %v168_v61 }
 0x132   :  { %v170_v6 = vmul.f32 %v300_v60, %v169_v3 }
 0x134   :  { %v171_v14 = vadd.f32 %v300_v60, %v170_v6 }
 0x136   :  { %v175_v18 = vsel %vm174_vm6, %v300_v60, %v171_v14 }
 0x137   :  { %v180_v16 = vsel %vm177_vm7, %v179_v15, %v175_v18 }
 0x138   :  { %v181_v19 = vmul.f32 -1.0, %v180_v16 }
 0x13a   :  { %v184_v20 = vmul.f32 %v181_v19, %v120_v13  ;;  %v183_v10 = vmul.f32 %v181_v19, %v119_v17  ;;  %v182_v21 = vmul.f32 %v181_v19, %v118_v12 }
 0x13c   :  { %v189_v22 = vmul.f32 1.442695, %v184_v20  ;;  %v187_v23 = vmul.f32 1.442695, %v183_v10  ;;  %v185_v24 = vmul.f32 1.442695, %v182_v21 }
 0x13e   :  { %301 = vpow2.f32 %v189_v22 }
 0x13f   :  { %303 = vpow2.f32 %v187_v23 }
 0x140   :  { %305 = vpow2.f32 %v185_v24 }
 0x144   :  { %v302_v26 = vpop.eup %301 }
 0x145   :  { %v304_v28 = vpop.eup %303  ;;  %v193_v29 = vmul.f32 %v302_v26, %v302_v26 }
 0x146   :  { %v306_v30 = vpop.eup %305  ;;  %v192_v31 = vmul.f32 %v304_v28, %v304_v28 }
 0x147   :  { %v196_v32 = vadd.f32 %v302_v26, %v193_v29  ;;  %v199_v33 = vmul.f32 %v193_v29, %v193_v29  ;;  %v191_v34 = vmul.f32 %v306_v30, %v306_v30 }
 0x148   :  { %v195_v35 = vadd.f32 %v304_v28, %v192_v31  ;;  %v198_v36 = vmul.f32 %v192_v31, %v192_v31 }
 0x149   :  { %v202_v37 = vadd.f32 %v199_v33, %v196_v32  ;;  %v205_v38 = vmul.f32 %v199_v33, %v199_v33  ;;  %v194_v39 = vadd.f32 %v306_v30, %v191_v34  ;;  %v197_v40 = vmul.f32 %v191_v34, %v191_v34 }
 0x14a   :  { %v201_v41 = vadd.f32 %v198_v36, %v195_v35  ;;  %v204_v42 = vmul.f32 %v198_v36, %v198_v36 }
 0x14b   :  { %v208_v43 = vadd.f32 %v205_v38, %v202_v37  ;;  %v211_v44 = vmul.f32 %v205_v38, %v205_v38  ;;  %v200_v45 = vadd.f32 %v197_v40, %v194_v39  ;;  %v203_v46 = vmul.f32 %v197_v40, %v197_v40 }
 0x14c   :  { %v207_v49 = vadd.f32 %v204_v42, %v201_v41  ;;  %v210_v50 = vmul.f32 %v204_v42, %v204_v42 }
 0x14d   :  { %v214_v51 = vadd.f32 %v211_v44, %v208_v43  ;;  %v206_v52 = vadd.f32 %v203_v46, %v200_v45  ;;  %v209_v53 = vmul.f32 %v203_v46, %v203_v46 }
 0x14e   :  { %v213_v54 = vadd.f32 %v210_v50, %v207_v49 }
 0x14f   :  { %v231_v55 = vmul.f32 %v228_v48, %v214_v51  ;;  %v212_v56 = vadd.f32 %v209_v53, %v206_v52 }
 0x150   :  { %v230_v57 = vmul.f32 %v228_v48, %v213_v54 }
 0x151   :  { %v238_v58 = vsel %vm130_vm1, %v231_v55, 0.0  ;;  %v229_v59 = vmul.f32 %v228_v48, %v212_v56 }
 0x152   :  { %239 = vadd.xlane.f32.xlu2 %v238_v58  ;;  %v235_v60 = vsel %vm130_vm1, %v230_v57, 0.0 }
 0x153   :  { %236 = vadd.xlane.f32.xlu1 %v235_v60  ;;  %v232_v61 = vsel %vm130_vm1, %v229_v59, 0.0 }
 0x154   :  { %233 = vadd.xlane.f32.xlu0 %v232_v61 }
 0x1c5   :  { %v240_v63 = vpop.xlane.xlu2 %239 }
 0x1c6   :  { %v237_v62 = vpop.xlane.xlu1 %236  ;;  %v243_v3 = vmul.f32 -0.0625, %v240_v63 }
 0x1c7   :  { %v242_v0 = vmul.f32 -0.0625, %v237_v62  ;;  %v234_v1 = vpop.xlane.xlu0 %233 }
 0x1c8   :  { %v241_v2 = vmul.f32 0.125, %v234_v1 }
 0x1ca   :  { %v244_v4 = vadd.f32 %v242_v0, %v241_v2 }
 0x1cc   :  { %v245_v5 = vadd.f32 %v244_v4, %v243_v3 }
 0x1ce   :  { %v246_v6 = vrot.slane %v245_v5, 4 }
 0x1d0   :  { %v247_v7 = vadd.f32 %v246_v6, %v245_v5 }
 0x1d2   :  { %v248_v8 = vrot.slane %v247_v7, 2 }
 0x1d4   :  { %v249_v9 = vadd.f32 %v248_v8, %v247_v7 }
 0x1d6   :  { %v250_v11 = vrot.slane %v249_v9, 1 }
 0x1d8   :  { %v251_v14 = vadd.f32 %v250_v11, %v249_v9 }
 0x1da   :  { %253 = vst.msk [vmem:[#allocation5] sm:$0x1] %vm252_vm9, %v251_v14 }
 0x1db   :  { %264 = dma.vmem_to_hbm [thread:$0]  %s260_s13, 16, %s262_s16, [#allocation4]  }
 0x1dc   :  { %357 = dma.done.wait [#allocation4], 16  }
 0x1dd   :  { %358 = vsyncadd [#allocation4], 4294967280 }
 0x1de   :  { %269 = vsyncpa [#allocation3], 1 }
 0x1df   :  { %270 = vsyncpa [#allocation4], 1 }

</bundles_post_ra>
